<compile_context>
chip_gen: v7x
topology: tpu7x:2x2x1
jax: 0.10.0
libtpu: 0.0.40
codegen_flags: <defaults>
</compile_context>

<pallas_src>
import functools

import jax
import jax.numpy as jnp
from jax.experimental import pallas as pl
from jax.experimental.pallas import tpu as pltpu


# --------------------------------------------------------------------------- #
# Kernels
# --------------------------------------------------------------------------- #
def _avg_pool_kernel(x_ref, p_ref, o_ref, acc_ref, *, inv_n):
    # x_ref: (TB, NT, D), p_ref: (TB, NT, 1), o_ref: (TB, D), acc_ref: (TB, D) f32
    k = pl.program_id(1)

    @pl.when(k == 0)
    def _init():
        acc_ref[...] = jnp.zeros_like(acc_ref)

    x = x_ref[...]
    p = p_ref[...].astype(x.dtype)               # 0/1 weights, broadcast over lanes
    # Partial sum over this N tile, accumulated in f32 (sublane reduce on XLU).
    acc_ref[...] += jnp.sum(x * p, axis=1, dtype=jnp.float32)

    @pl.when(k == pl.num_programs(1) - 1)
    def _finalize():
        # Matches PyTorch: mean divides by N, not by sum(presence).
        o_ref[...] = (acc_ref[...] * inv_n).astype(o_ref.dtype)


def _max_pool_kernel(x_ref, p_ref, o_ref, acc_ref, *, sentinel):
    # x_ref: (TB, NT, D), p_ref: (TB, NT, 1), o_ref: (TB, D), acc_ref: (TB, D) f32
    k = pl.program_id(1)

    @pl.when(k == 0)
    def _init():
        acc_ref[...] = jnp.full(acc_ref.shape, -jnp.inf, dtype=acc_ref.dtype)

    x = x_ref[...]
    p = p_ref[...]
    # Single select with a constant sentinel instead of min(X)-1 fed from a second
    # HBM pass of X.  Matches PyTorch exactly whenever a row has >=1 present entry.
    masked = jnp.where(p != 0, x, jnp.asarray(sentinel, dtype=x.dtype))
    acc_ref[...] = jnp.maximum(acc_ref[...],
                               jnp.max(masked, axis=1).astype(jnp.float32))

    @pl.when(k == pl.num_programs(1) - 1)
    def _finalize():
        o_ref[...] = acc_ref[...].astype(o_ref.dtype)


# --------------------------------------------------------------------------- #
# Tile selection
# --------------------------------------------------------------------------- #
def _choose_tiles(B, N, D, x_dtype, p_dtype, vmem_block_budget=4 * 1024 * 1024):
    """Pick (TB, NT) so one grid step's blocks (X tile + lane-padded presence tile)
    stay within a budget that is safe when double-buffered on v5e/v6e and on
    v7x's halved 64 MiB VMEM."""
    x_item = jnp.dtype(x_dtype).itemsize
    p_item = jnp.dtype(p_dtype).itemsize
    pack = max(1, 4 // x_item)            # rows per sublane: f32->1, bf16->2
    sub = 8 * pack                        # N-tile granularity (full packed sublanes)
    # VMEM bytes per (b, n) row: D lanes of X plus the presence row, whose single
    # lane gets padded out to a full 128-lane tile in VMEM.
    per_row = D * x_item + 128 * p_item
    per_batch = N * per_row

    # N tile: whole N if it fits, else the largest multiple of `sub` dividing N.
    if per_batch <= vmem_block_budget:
        nt = N
    else:
        nt = 0
        t = (max(sub, vmem_block_budget // per_row) // sub) * sub
        while t >= sub:
            if N % t == 0:
                nt = t
                break
            t -= sub
        if nt == 0:
            nt = N                        # ragged N: keep whole (correctness first)

    # Batch tile: as many batches as fit; prefer TB == B (full dim) or a multiple
    # of 8 dividing B so the (TB, D) output block keeps full sublanes.
    max_tb = max(1, vmem_block_budget // max(1, nt * per_row))
    if B <= max_tb:
        tb = B
    else:
        tb = 0
        for cand in range(min(B, max_tb), 0, -1):
            if B % cand == 0 and cand % 8 == 0:
                tb = cand
                break
        if tb == 0:
            for cand in range(min(B, max_tb), 0, -1):
                if B % cand == 0:
                    tb = cand
                    break
    return tb, nt


# --------------------------------------------------------------------------- #
# Wrapper
# --------------------------------------------------------------------------- #
def group_pool(X, presence, pool_fn="average"):
    assert pool_fn in ("average", "max")
    B, N, D = X.shape
    # presence.unsqueeze(-1) -> (B, N, 1); row-major so this is a free reshape, and
    # N lands on sublanes so the broadcast over D (lanes) inside the kernel is cheap.
    p3 = presence.reshape(B, N, 1)

    tb, nt = _choose_tiles(B, N, D, X.dtype, p3.dtype)
    grid = (B // tb, N // nt)             # tiny shapes collapse to a single step

    x_spec = pl.BlockSpec((tb, nt, D), lambda b, k: (b, k, 0))
    p_spec = pl.BlockSpec((tb, nt, 1), lambda b, k: (b, k, 0))
    # Same output block for every k -> block stays resident across the reduction
    # axis (accumulator pattern); lane-dense (TB, D) store, no size-1 middle dim.
    o_spec = pl.BlockSpec((tb, D), lambda b, k: (b, 0))
    out_shape = jax.ShapeDtypeStruct((B, D), X.dtype)

    if pool_fn == "average":
        kernel = functools.partial(_avg_pool_kernel, inv_n=1.0 / N)
    else:
        if jnp.issubdtype(X.dtype, jnp.floating):
            sentinel = float(jnp.finfo(X.dtype).min)
        else:
            sentinel = int(jnp.iinfo(X.dtype).min)
        kernel = functools.partial(_max_pool_kernel, sentinel=sentinel)
        # TODO(synk): torch.max(X, dim=1) also returns argmax indices, and rows with
        # all-zero presence return the finite dtype-min sentinel instead of min(X)-1.

    out = pl.pallas_call(
        kernel,
        grid=grid,
        in_specs=[x_spec, p_spec],
        out_specs=o_spec,
        out_shape=out_shape,
        scratch_shapes=[pltpu.VMEM((tb, D), jnp.float32)],
        compiler_params=pltpu.CompilerParams(
            dimension_semantics=("parallel", "arbitrary"),
            vmem_limit_bytes=32 * 1024 * 1024,
        ),
    )(X, p3)
    return out


# --------------------------------------------------------------------------- #
# Test
# --------------------------------------------------------------------------- #
if __name__ == "__main__":
    key = jax.random.PRNGKey(0)
    kx, kp = jax.random.split(key)
    B, N, D = 2, 8, 32
    X = jax.random.normal(kx, (B, N, D), dtype=jnp.float32)
    presence = (jax.random.uniform(kp, (B, N)) > 0.3).astype(jnp.float32)
    # Ensure every batch has at least one present element (the sentinel-masked max
    # matches PyTorch exactly in that case).
    presence = presence.at[:, 0].set(1.0)

    # default pool_fn='average'
    out_avg = group_pool(X, presence, pool_fn="average")
    jax.block_until_ready(out_avg)
    ref_avg = jnp.mean(X * presence[..., None], axis=1)
    assert out_avg.shape == (B, D)
    assert jnp.allclose(out_avg, ref_avg, atol=1e-5, rtol=1e-5)

    # 'max' variant (reference mirrors the PyTorch formula with mask = min(X) - 1)
    out_max = group_pool(X, presence, pool_fn="max")
    jax.block_until_ready(out_max)
    mask = jnp.min(X) - 1.0
    ref_max = jnp.max(
        X * presence[..., None] + mask * (1.0 - presence[..., None]), axis=1
    )
    assert out_max.shape == (B, D)
    assert jnp.allclose(out_max, ref_max, atol=1e-5, rtol=1e-5)

    # bf16 average path (exercises sublane packing + f32 accumulation)
    Xb = X.astype(jnp.bfloat16)
    out_bf16 = group_pool(Xb, presence, pool_fn="average")
    jax.block_until_ready(out_bf16)
    ref_bf16 = jnp.mean(Xb.astype(jnp.float32) * presence[..., None], axis=1)
    assert jnp.allclose(out_bf16.astype(jnp.float32), ref_bf16, atol=2e-2, rtol=2e-2)

    print("KERNEL_OK")
</pallas_src>

<mosaic_0001>
module attributes {stable_mosaic.version = 11 : i64} {
  func.func @_avg_pool_kernel(%arg0: i32, %arg1: i32, %arg2: memref<2x8x32xf32, #tpu.memory_space<vmem>>, %arg3: memref<2x8x1xf32, #tpu.memory_space<vmem>>, %arg4: memref<2x32xf32, #tpu.memory_space<vmem>>, %arg5: memref<2x32xf32, #tpu.memory_space<vmem>>) attributes {dimension_semantics = [#tpu.dimension_semantics<parallel>, #tpu.dimension_semantics<arbitrary>], iteration_bounds = array<i64: 1, 1>, scalar_prefetch = 0 : i64, scratch_operands = 1 : i64, tpu.core_type = #tpu.core_type<tc>, window_params = [{transform_indices = @transform_0, window_bounds = array<i64: 2, 8, 32>}, {transform_indices = @transform_1, window_bounds = array<i64: 2, 8, 1>}, {transform_indices = @transform_2, window_bounds = array<i64: 2, 32>}]} {
    %c0_i32 = arith.constant 0 : i32
    %0 = arith.cmpi eq, %arg1, %c0_i32 : i32
    %1 = arith.extui %0 : i1 to i32
    %c0_i32_0 = arith.constant 0 : i32
    %2 = arith.cmpi ne, %1, %c0_i32_0 : i32
    scf.if %2 {
      %cst_12 = arith.constant 0.000000e+00 : f32
      %14 = vector.broadcast %cst_12 : f32 to vector<2x32xf32>
      %c0_13 = arith.constant 0 : index
      %c0_14 = arith.constant 0 : index
      %15 = vector.load %arg5[%c0_13, %c0_14] : memref<2x32xf32, #tpu.memory_space<vmem>>, vector<2x32xf32>
      tpu.vector_store %arg5[%c0_13, %c0_14], %14 {strides = array<i32>} : memref<2x32xf32, #tpu.memory_space<vmem>>, vector<2x32xf32>,
    } else {
    }
    %c0 = arith.constant 0 : index
    %c0_1 = arith.constant 0 : index
    %c0_2 = arith.constant 0 : index
    %3 = vector.load %arg2[%c0, %c0_1, %c0_2] : memref<2x8x32xf32, #tpu.memory_space<vmem>>, vector<2x8x32xf32>
    %c0_3 = arith.constant 0 : index
    %c0_4 = arith.constant 0 : index
    %c0_5 = arith.constant 0 : index
    %4 = vector.load %arg3[%c0_3, %c0_4, %c0_5] : memref<2x8x1xf32, #tpu.memory_space<vmem>>, vector<2x8x1xf32>
    %c0_6 = arith.constant 0 : index
    %c0_7 = arith.constant 0 : index
    %5 = vector.load %arg5[%c0_6, %c0_7] : memref<2x32xf32, #tpu.memory_space<vmem>>, vector<2x32xf32>
    %6 = vector.broadcast %4 : vector<2x8x1xf32> to vector<2x8x32xf32>
    %7 = arith.mulf %3, %6 : vector<2x8x32xf32>
    %cst = arith.constant dense<0.000000e+00> : vector<2x32xf32>
    %8 = vector.multi_reduction <add>, %7, %cst [1] : vector<2x8x32xf32> to vector<2x32xf32>
    %9 = arith.addf %5, %8 : vector<2x32xf32>
    %c0_8 = arith.constant 0 : index
    %c0_9 = arith.constant 0 : index
    %10 = vector.load %arg5[%c0_8, %c0_9] : memref<2x32xf32, #tpu.memory_space<vmem>>, vector<2x32xf32>
    tpu.vector_store %arg5[%c0_8, %c0_9], %9 {strides = array<i32>} : memref<2x32xf32, #tpu.memory_space<vmem>>, vector<2x32xf32>,
    %c0_i32_10 = arith.constant 0 : i32
    %11 = arith.cmpi eq, %arg1, %c0_i32_10 : i32
    %12 = arith.extui %11 : i1 to i32
    %c0_i32_11 = arith.constant 0 : i32
    %13 = arith.cmpi ne, %12, %c0_i32_11 : i32
    scf.if %13 {
      %c0_12 = arith.constant 0 : index
      %c0_13 = arith.constant 0 : index
      %14 = vector.load %arg5[%c0_12, %c0_13] : memref<2x32xf32, #tpu.memory_space<vmem>>, vector<2x32xf32>
      %cst_14 = arith.constant 1.250000e-01 : f32
      %15 = vector.broadcast %cst_14 : f32 to vector<2x32xf32>
      %16 = arith.mulf %14, %15 : vector<2x32xf32>
      %c0_15 = arith.constant 0 : index
      %c0_16 = arith.constant 0 : index
      %17 = vector.load %arg4[%c0_15, %c0_16] : memref<2x32xf32, #tpu.memory_space<vmem>>, vector<2x32xf32>
      tpu.vector_store %arg4[%c0_15, %c0_16], %16 {strides = array<i32>} : memref<2x32xf32, #tpu.memory_space<vmem>>, vector<2x32xf32>,
    } else {
    }
    return
  }
  func.func @transform_0(%arg0: i32, %arg1: i32) -> (i32, i32, i32) {
    %c0_i32 = arith.constant 0 : i32
    %c0_i32_0 = arith.constant 0 : i32
    return %arg0, %arg1, %c0_i32 : i32, i32, i32
  }
  func.func @transform_1(%arg0: i32, %arg1: i32) -> (i32, i32, i32) {
    %c0_i32 = arith.constant 0 : i32
    %c0_i32_0 = arith.constant 0 : i32
    return %arg0, %arg1, %c0_i32 : i32, i32, i32
  }
  func.func @transform_2(%arg0: i32, %arg1: i32) -> (i32, i32) {
    %c0_i32 = arith.constant 0 : i32
    %c0_i32_0 = arith.constant 0 : i32
    return %arg0, %c0_i32 : i32, i32
  }
}

</mosaic_0001>

<bundles_post_ra>
// kernel: tpu_custom_call.1
= control target key start
LH: loop header
LB: loop body
LE: loop exit
PB: predicated region body
PF: predicated region fallthrough
CT: control target
= control target key end

     0   :  { %s151_s0 = inlined_call_operand.vmem [shape: f32[2,8,32], index: 0, kind: input, shape index: {}]   ;;  %s152_s1 = inlined_call_operand.vmem [shape: f32[2,8,1], index: 1, kind: input, shape index: {}]   ;;  %s153_s2 = inlined_call_operand.hbm [shape: f32[2,32], index: 2, kind: output, shape index: {}]  }
   0x1   :  { %v20_v0 = vld [vmem:[%s152_s1] sm:$0xff] }
   0x2   :  { %7 = vsyncpa [#allocation4], 0  ;;  %v106_v1 = vmov 0   ;;  %v21_v2 = vld [vmem:[%s152_s1 + $0x8] sm:$0xff]  ;;  %vm16_vm0 = vcmask 254976   ;;  %v107_v3 = vmov 0.0  }
   0x3   :  { %81 = vset.pattern.permute.xlu0 %v106_v1  ;;  %17 = vst.msk [vmem:[#allocation2] sm:$0x3] %vm16_vm0, %v107_v3  ;;  %v18_v4 = vld [vmem:[%s151_s0] sm:$0xff]  ;;  %vm35_vm1 = vcmask 261120   ;;  %v19_v7 = vld [vmem:[%s151_s0 + $0x8] sm:$0xff]  ;;  %vm52_vm2 = vcmask 1041409  }
   0x4   :  { %25 = vperm.xlu0 %81, %v20_v0   ;;  %s108_s0 = smov [#allocation3]  }
   0x5   :  { %s70_s1 = sshll.u32 %s108_s0, 4  ;;  %s71_s1 = int_to_ptr.vmem [resolvable:$true] %s70_s1 }
   0x6   :  { %s82_s17 = scalar_lea.vmem %s71_s1, 32  ;;  %p87_p1 = scmp.lt.s32.totalorder %s71_s1, %s71_s1 }
   0x7   :  { %p83_p0 = scmp.ne.s32.totalorder %s71_s1, %s82_s17  ;;  %p88_p2 = scmp.lt.s32.totalorder %s82_s17, %s82_s17 }
   0x8   :  { %30 = vperm.xlu0 %81, %v21_v2  }
   0x9   :  { %p89_p3 = por %p88_p2, %p87_p1 }
   0xa   :  { %v22_v24 = vld [vmem:[#allocation2] sm:$0x3] }
   0xb   :  { %p90_p4 = pnand %p89_p3, %p83_p0 }
  0x83   :  { %v26_v5 = vpop.permute.xlu0 %25 }
  0x84   :  { %v33_v6 = vmul.f32 %v26_v5, %v18_v4 }
  0x86   :  { %v36_v8 = vsel %vm35_vm1, %v33_v6, 0.0 }
  0x87   :  { %v37_v9 = vrot.slane %v36_v8, 4  ;;  %v31_v10 = vpop.permute.xlu0 %30 }
  0x88   :  { %v34_v11 = vmul.f32 %v31_v10, %v19_v7 }
  0x89   :  { %v38_v12 = vadd.f32 %v37_v9, %v36_v8 }
  0x8a   :  { %v43_v13 = vsel %vm35_vm1, %v34_v11, 0.0 }
  0x8b   :  { %v39_v14 = vrot.slane %v38_v12, 2  ;;  %v44_v15 = vrot.slane %v43_v13, 4 }
  0x8d   :  { %v40_v16 = vadd.f32 %v39_v14, %v38_v12  ;;  %v45_v17 = vadd.f32 %v44_v15, %v43_v13 }
  0x8f   :  { %v46_v18 = vrot.slane %v45_v17, 2  ;;  %v41_v19 = vrot.slane %v40_v16, 1 }
  0x91   :  { %v47_v20 = vadd.f32 %v46_v18, %v45_v17  ;;  %v42_v22 = vadd.f32 %v41_v19, %v40_v16 }
  0x93   :  { %v48_v21 = vrot.slane %v47_v20, 1 }
  0x95   :  { %v49_v23 = vadd.f32 %v48_v21, %v47_v20 }
  0x97   :  { %v53_v25 = vsel %vm52_vm2, %v49_v23, %v42_v22 }
  0x98   :  { %v55_v26 = vadd.f32 %v53_v25, %v22_v24 }
  0x9a   :  { %57 = vst.msk [vmem:[#allocation2] sm:$0x3] %vm16_vm0, %v55_v26 }
  0xa1   :  { %v61_v27 = vld [vmem:[#allocation2] sm:$0x3] }
  0xa2   :  { %v62_v28 = vmul.f32 0.125, %v61_v27 }
  0xa4   :  { %63 = vst.msk [vmem:[#allocation3] sm:$0x3] %vm16_vm0, %v62_v28 }
  0xa5   :  { %93 = shalt.err (!%p90_p4)
}
  0xa6   :  { %s94_s20 = scalar_lea.hbm %s153_s2, 32 }
  0xa7   :  { %p95_p5 = scmp.ne.s32.totalorder %s153_s2, %s94_s20  ;;  %p98_p6 = scmp.lt.u32.totalorder %s94_s20, %s153_s2 }
  0xa9   :  { %p100_p7 = pnand %p98_p6, %p95_p5 }
  0xab   :  { %103 = shalt.err (!%p100_p7)
}
  0xac   :  { %73 = dma.vmem_to_hbm [thread:$0]  %s71_s1, 32, %s153_s2, [#allocation4]  }
  0xad   :  { %104 = dma.done.wait [#allocation4], 32  }
  0xae   :  { %105 = vsyncadd [#allocation4], 4294967264 }
  0xaf   :  { %77 = vsyncpa [#allocation4], 1 }

</bundles_post_ra>
